<compile_context>
chip_gen: v7x
topology: tpu7x:2x2x1
jax: 0.10.0
libtpu: 0.0.40
codegen_flags: <defaults>
</compile_context>

<pallas_src>
import functools

import jax
import jax.numpy as jnp
from jax import lax
from jax.experimental import pallas as pl
from jax.experimental.pallas import tpu as pltpu


def _cos_loss_kernel(x1_ref, x2_ref, out_ref, *, n_valid, tile_n, eps, needs_mask):
    # x1_ref/x2_ref: (C, tile_n) VMEM tiles of one batch element.
    # out_ref:       (8, tile_n) per-batch partial-sum block (row 0 used),
    #                resident across the tile axis (accumulator pattern).
    j = pl.program_id(1)

    @pl.when(j == 0)
    def _():
        out_ref[...] = jnp.zeros_like(out_ref)

    x1 = x1_ref[...].astype(jnp.float32)                      # (C, tile_n)
    x2 = x2_ref[...].astype(jnp.float32)                      # (C, tile_n)

    dot = jnp.sum(x1 * x2, axis=0, keepdims=True)             # (1, tile_n)
    s1 = jnp.sum(x1 * x1, axis=0, keepdims=True)              # (1, tile_n)
    s2 = jnp.sum(x2 * x2, axis=0, keepdims=True)              # (1, tile_n)

    # max(sqrt(s), eps) == sqrt(max(s, eps^2))  (eps > 0), so:
    #   1 / (max(||x1||,eps) * max(||x2||,eps)) = rsqrt(max(s1,eps^2)) * rsqrt(max(s2,eps^2))
    eps2 = eps * eps
    cos = dot * lax.rsqrt(jnp.maximum(s1, eps2)) * lax.rsqrt(jnp.maximum(s2, eps2))

    contrib = 1.0 - cos                                       # (1, tile_n)
    if needs_mask:
        # Only traced when H*W is not a multiple of tile_n: zero out columns
        # past the true spatial extent (out-of-bounds block reads are garbage).
        col = j * tile_n + lax.broadcasted_iota(jnp.int32, (1, tile_n), 1)
        contrib = jnp.where(col < n_valid, contrib, 0.0)

    out_ref[0:1, :] += contrib


def _pick_tile(hw, c, max_tile=8192, vmem_budget_bytes=8 << 20):
    """Largest lane-dim tile: full extent if it fits, else a multiple of 128.

    Budget keeps 2 inputs x 2 pipeline buffers x C x tile_n x 4B well under the
    smallest scoped-VMEM default across generations (v5e: 16 MiB).
    """
    cap = max(128, min(max_tile, vmem_budget_bytes // (4 * 4 * max(c, 1))))
    if hw <= cap:
        return hw                      # full-extent last dim is always legal
    return (cap // 128) * 128          # multiple of 128, partial last tile masked


def cosine_similarity_loss(input1, input2, *, eps=1e-8, max_tile_n=8192):
    """Pallas equivalent of CosineSimilarityLoss().forward(input1, input2).

    input1, input2: NCHW arrays of identical shape (B, C, H, W).
    Returns a float32 scalar.
    """
    assert input1.shape == input2.shape
    B, C, H, W = input1.shape
    HW = H * W

    # Free, contiguous reshape (no transpose / extra HBM pass).
    x1 = input1.reshape(B, C, HW)
    x2 = input2.reshape(B, C, HW)

    tile_n = _pick_tile(HW, C, max_tile_n)
    n_tiles = pl.cdiv(HW, tile_n)
    needs_mask = (HW % tile_n) != 0

    kernel = functools.partial(
        _cos_loss_kernel,
        n_valid=int(HW),
        tile_n=int(tile_n),
        eps=float(eps),
        needs_mask=needs_mask,
    )

    partials = pl.pallas_call(
        kernel,
        out_shape=jax.ShapeDtypeStruct((B, 8, tile_n), jnp.float32),
        grid_spec=pltpu.PrefetchScalarGridSpec(
            num_scalar_prefetch=0,
            grid=(B, n_tiles),
            in_specs=[
                pl.BlockSpec((None, C, tile_n), lambda b, j: (b, 0, j)),
                pl.BlockSpec((None, C, tile_n), lambda b, j: (b, 0, j)),
            ],
            out_specs=pl.BlockSpec((None, 8, tile_n), lambda b, j: (b, 0, 0)),
        ),
        compiler_params=pltpu.CompilerParams(
            dimension_semantics=("parallel", "arbitrary"),
        ),
    )(x1, x2)

    # Tiny final reduction + mean on the host/XLA side.
    return jnp.sum(partials) / jnp.float32(B * HW)


def _reference(input1, input2, eps=1e-8):
    x1 = input1.astype(jnp.float32)
    x2 = input2.astype(jnp.float32)
    dot = jnp.sum(x1 * x2, axis=1)
    n1 = jnp.maximum(jnp.sqrt(jnp.sum(x1 * x1, axis=1)), eps)
    n2 = jnp.maximum(jnp.sqrt(jnp.sum(x2 * x2, axis=1)), eps)
    cos = dot / (n1 * n2)
    return jnp.mean(1.0 - cos)


if __name__ == "__main__":
    key = jax.random.PRNGKey(0)
    k1, k2 = jax.random.split(key)

    B, C, H, W = 2, 4, 16, 16   # NCHW, cosine similarity over dim=1 (C)
    x1 = jax.random.normal(k1, (B, C, H, W), dtype=jnp.float32)
    x2 = jax.random.normal(k2, (B, C, H, W), dtype=jnp.float32)

    loss = cosine_similarity_loss(x1, x2)
    jax.block_until_ready(loss)

    ref = _reference(x1, x2)
    assert jnp.allclose(loss, ref, atol=1e-5, rtol=1e-5), (loss, ref)

    print("KERNEL_OK")
</pallas_src>

<mosaic_0001>
module attributes {stable_mosaic.version = 11 : i64} {
  func.func @_cos_loss_kernel(%arg0: i32, %arg1: i32, %arg2: memref<1x4x256xf32, #tpu.memory_space<vmem>>, %arg3: memref<1x4x256xf32, #tpu.memory_space<vmem>>, %arg4: memref<1x8x256xf32, #tpu.memory_space<vmem>>) attributes {dimension_semantics = [#tpu.dimension_semantics<parallel>, #tpu.dimension_semantics<arbitrary>], iteration_bounds = array<i64: 2, 1>, scalar_prefetch = 0 : i64, scratch_operands = 0 : i64, tpu.core_type = #tpu.core_type<tc>, window_params = [{transform_indices = @transform_0, window_bounds = array<i64: 1, 4, 256>}, {transform_indices = @transform_1, window_bounds = array<i64: 1, 4, 256>}, {transform_indices = @transform_2, window_bounds = array<i64: 1, 8, 256>}]} {
    %c0_i32 = arith.constant 0 : i32
    %0 = arith.cmpi eq, %arg1, %c0_i32 : i32
    %1 = arith.extui %0 : i1 to i32
    %c0_i32_0 = arith.constant 0 : i32
    %2 = arith.cmpi ne, %1, %c0_i32_0 : i32
    scf.if %2 {
      %cst_17 = arith.constant 0.000000e+00 : f32
      %32 = vector.broadcast %cst_17 : f32 to vector<8x256xf32>
      %c0_18 = arith.constant 0 : index
      %c0_19 = arith.constant 0 : index
      %c0_20 = arith.constant 0 : index
      %33 = vector.load %arg4[%c0_18, %c0_19, %c0_20] : memref<1x8x256xf32, #tpu.memory_space<vmem>>, vector<1x8x256xf32>
      %34 = vector.shape_cast %33 : vector<1x8x256xf32> to vector<8x256xf32>
      %35 = vector.shape_cast %32 : vector<8x256xf32> to vector<1x8x256xf32>
      tpu.vector_store %arg4[%c0_18, %c0_19, %c0_20], %35 {strides = array<i32>} : memref<1x8x256xf32, #tpu.memory_space<vmem>>, vector<1x8x256xf32>,
    } else {
    }
    %c0 = arith.constant 0 : index
    %c0_1 = arith.constant 0 : index
    %c0_2 = arith.constant 0 : index
    %3 = vector.load %arg2[%c0, %c0_1, %c0_2] : memref<1x4x256xf32, #tpu.memory_space<vmem>>, vector<1x4x256xf32>
    %4 = vector.shape_cast %3 : vector<1x4x256xf32> to vector<4x256xf32>
    %c0_3 = arith.constant 0 : index
    %c0_4 = arith.constant 0 : index
    %c0_5 = arith.constant 0 : index
    %5 = vector.load %arg3[%c0_3, %c0_4, %c0_5] : memref<1x4x256xf32, #tpu.memory_space<vmem>>, vector<1x4x256xf32>
    %6 = vector.shape_cast %5 : vector<1x4x256xf32> to vector<4x256xf32>
    %7 = arith.mulf %4, %6 : vector<4x256xf32>
    %cst = arith.constant dense<0.000000e+00> : vector<256xf32>
    %8 = vector.multi_reduction <add>, %7, %cst [0] : vector<4x256xf32> to vector<256xf32>
    %9 = vector.shape_cast %8 : vector<256xf32> to vector<1x256xf32>
    %10 = arith.mulf %4, %4 : vector<4x256xf32>
    %cst_6 = arith.constant dense<0.000000e+00> : vector<256xf32>
    %11 = vector.multi_reduction <add>, %10, %cst_6 [0] : vector<4x256xf32> to vector<256xf32>
    %12 = vector.shape_cast %11 : vector<256xf32> to vector<1x256xf32>
    %13 = arith.mulf %6, %6 : vector<4x256xf32>
    %cst_7 = arith.constant dense<0.000000e+00> : vector<256xf32>
    %14 = vector.multi_reduction <add>, %13, %cst_7 [0] : vector<4x256xf32> to vector<256xf32>
    %15 = vector.shape_cast %14 : vector<256xf32> to vector<1x256xf32>
    %cst_8 = arith.constant 1.000000e-16 : f32
    %16 = vector.broadcast %cst_8 : f32 to vector<1x256xf32>
    %17 = arith.maximumf %12, %16 : vector<1x256xf32>
    %18 = math.rsqrt %17 : vector<1x256xf32>
    %19 = arith.mulf %9, %18 : vector<1x256xf32>
    %cst_9 = arith.constant 1.000000e-16 : f32
    %20 = vector.broadcast %cst_9 : f32 to vector<1x256xf32>
    %21 = arith.maximumf %15, %20 : vector<1x256xf32>
    %22 = math.rsqrt %21 : vector<1x256xf32>
    %23 = arith.mulf %19, %22 : vector<1x256xf32>
    %cst_10 = arith.constant 1.000000e+00 : f32
    %24 = vector.broadcast %cst_10 : f32 to vector<1x256xf32>
    %25 = arith.subf %24, %23 : vector<1x256xf32>
    %c0_11 = arith.constant 0 : index
    %c0_12 = arith.constant 0 : index
    %c0_13 = arith.constant 0 : index
    %26 = vector.load %arg4[%c0_11, %c0_12, %c0_13] : memref<1x8x256xf32, #tpu.memory_space<vmem>>, vector<1x1x256xf32>
    %27 = vector.shape_cast %26 : vector<1x1x256xf32> to vector<1x256xf32>
    %28 = arith.addf %27, %25 : vector<1x256xf32>
    %c0_14 = arith.constant 0 : index
    %c0_15 = arith.constant 0 : index
    %c0_16 = arith.constant 0 : index
    %29 = vector.load %arg4[%c0_14, %c0_15, %c0_16] : memref<1x8x256xf32, #tpu.memory_space<vmem>>, vector<1x1x256xf32>
    %30 = vector.shape_cast %29 : vector<1x1x256xf32> to vector<1x256xf32>
    %31 = vector.shape_cast %28 : vector<1x256xf32> to vector<1x1x256xf32>
    tpu.vector_store %arg4[%c0_14, %c0_15, %c0_16], %31 {strides = array<i32>} : memref<1x8x256xf32, #tpu.memory_space<vmem>>, vector<1x1x256xf32>,
    return
  }
  func.func @transform_0(%arg0: i32, %arg1: i32) -> (i32, i32, i32) {
    %c0_i32 = arith.constant 0 : i32
    %c0_i32_0 = arith.constant 0 : i32
    return %arg0, %c0_i32, %arg1 : i32, i32, i32
  }
  func.func @transform_1(%arg0: i32, %arg1: i32) -> (i32, i32, i32) {
    %c0_i32 = arith.constant 0 : i32
    %c0_i32_0 = arith.constant 0 : i32
    return %arg0, %c0_i32, %arg1 : i32, i32, i32
  }
  func.func @transform_2(%arg0: i32, %arg1: i32) -> (i32, i32, i32) {
    %c0_i32 = arith.constant 0 : i32
    %c0_i32_0 = arith.constant 0 : i32
    %c0_i32_1 = arith.constant 0 : i32
    return %arg0, %c0_i32, %c0_i32_0 : i32, i32, i32
  }
}

</mosaic_0001>

<bundles_post_ra>
// kernel: tpu_custom_call.1
= control target key start
LH: loop header
LB: loop body
LE: loop exit
PB: predicated region body
PF: predicated region fallthrough
CT: control target
= control target key end

     0   :  { %7 = vsyncpa [#allocation3], 0  ;;  %s946_s0 = inlined_call_operand.hbm [shape: f32[2,4,256], index: 0, kind: input, shape index: {}]   ;;  %s947_s1 = inlined_call_operand.hbm [shape: f32[2,4,256], index: 1, kind: input, shape index: {}]   ;;  %s948_s2 = inlined_call_operand.hbm [shape: f32[2,8,256], index: 2, kind: output, shape index: {}]  }
   0x1   :  { %9 = vsyncpa [#allocation3 + $0x1], 0 }
   0x2   :  { %10 = vsyncpa [#allocation6], 0 }
   0x3   :  { %12 = vsyncpa [#allocation6 + $0x1], 0 }
   0x4   :  { %13 = vsyncpa [#allocation4], 0 }
   0x5   :  { %15 = vsyncpa [#allocation4 + $0x1], 0  ;;  %s712_s9 = smov 0   ;;  %s714_s10 = smov 0  }
   0x6   :  { %s716_s11 = smov 0   ;;  %s718_s12 = smov 0  }
   0x7   :  { %s720_s13 = smov 0   ;;  %s722_s14 = smov 0  }
   0x8 LB: > { %s445_s15 = sadd.s32 4294967295, %s690_s14   ;;  %s446_s16 = sadd.s32 4294967294, %s690_s14   ;;  %s690_s14 = sphi %s722_s14, %s21_s14   ;;  %s686_s13 = sphi %s720_s13, %s968_s13   ;;  %s682_s12 = sphi %s718_s12, %s967_s12   ;;  %s678_s11 = sphi %s716_s11, %s966_s11   ;;  %s674_s10 = sphi %s714_s10, %s965_s10   ;;  %s670_s9 = sphi %s712_s9, %s964_s9  }
   0x9   : > { %s33_s17 = sadd.s32 1, %s686_s13  ;;  %s42_s18 = sadd.s32 1, %s678_s11 }
   0xa   : > { %p35_p0 = scmp.ge.s32.totalorder %s33_s17, 2  ;;  %p49_p1 = scmp.ne.s32.totalorder %s678_s11, %s674_s10 }
   0xb   : > { %p50_p2 = scmp.eq.s32.totalorder %s690_s14, 0  ;;  %p55_p3 = scmp.ne.s32.totalorder %s674_s10, %s670_s9 }
   0xc   : > { %s970_s17 = smov (%p35_p0, %s33_s17), 0  ;;  %p56_p5 = scmp.eq.s32.totalorder %s445_s15, 0 }
   0xd   : > { %p753_p4 = por %p50_p2, %p49_p1  ;;  %s37_s20 = ssub.s32 %s686_s13, %s970_s17 }
   0xe   : > { %p107_p6 = scmp.eq.s32.totalorder %s445_s15, 1  ;;  %p40_p7 = scmp.eq.s32.totalorder %s37_s20, 0 }
   0xf   : > { %p759_p8 = por %p56_p5, %p55_p3  ;;  %p113_p10 = scmp.eq.s32.totalorder %s446_s16, 1 }
  0x10   : > { %p763_p9 = por %p107_p6, %p49_p1  ;;  %p484_p13 = scmp.lt.s32.totalorder %s690_s14, 2 }
  0x11   : > { %s952_s21 = scalar_select %p759_p8, 1, 0 }
  0x12   : > { %s953_s22 = scalar_select %p763_p9, 1, 0 }
  0x13   : > { %s768_s23 = scalar_select %p40_p7, %s678_s11, %s42_s18  }
  0x14   : > { %p770_p11 = por %p113_p10, %p55_p3  ;;  %s777_s25 = sand.u32 1, %s678_s11  }
  0x15   : > { %s449_s26 = sshll.u32 %s777_s25, 3  ;;  %s464_s27 = sshll.u32 %s686_s13, 7 }
  0x16   : > { %s954_s24 = scalar_select %p770_p11, 1, 0 }
  0x17   : > { %s786_s30 = scalar_lea.hbm %s946_s0, %s464_s27  ;;  %s137_s3 = scalar_lea.vmem [#allocation2], %s449_s26 }
  0x18   : > { %s147_s4 = sshll.u32 %s137_s3, 4  ;;  %p794_p0 = pnand %p484_p13, %p753_p4  ;;  %s790_s4 = int_to_ptr.vmem [resolvable:$true] %s147_s4 }
  0x19   : > { %s134_s6 = scalar_lea.sflag [#allocation3], %s777_s25  ;;  %s544_s7 = scalar_lea.hbm %s786_s30, 128 }
  0x1a   : > { %p545_p3 = scmp.ne.s32.totalorder %s786_s30, %s544_s7  ;;  %p546_p5 = pneg %p794_p0 }
  0x1b   : > { %s549_s16 = scalar_lea.hbm %s946_s0, 256  ;;  %p550_p4 = scmp.lt.u32.totalorder %s786_s30, %s946_s0 }
  0x1c   : > { %p547_p6 = pnand %p546_p5, %p545_p3  ;;  %p551_p10 = scmp.lt.u32.totalorder %s549_s16, %s544_s7 }
  0x1d   : > { %p553_p12 = scmp.lt.u32.totalorder %s544_s7, %s786_s30 }
  0x1e   : > { %p548_p7 = pneg %p547_p6  ;;  %p552_p13 = por %p551_p10, %p550_p4 }
  0x20   : > { %p554_p1 = por %p553_p12, %p552_p13 }
  0x22   : > { %p555_p2 = pnand %p554_p1, %p548_p7 }
  0x24   : > { %558 = shalt.err (!%p555_p2)
}
  0x25   : > { %s559_s20 = scalar_lea.vmem %s790_s4, 128  ;;  %s692_s28 = smov [#allocation2]  }
  0x26   : > { %p560_p3 = scmp.ne.s32.totalorder %s790_s4, %s559_s20  ;;  %s564_s29 = sshll.u32 %s692_s28, 4  ;;  %s565_s29 = int_to_ptr.vmem [resolvable:$false] %s564_s29 }
  0x27   : > { %s566_s3 = scalar_lea.vmem %s565_s29, 256  ;;  %p567_p9 = scmp.lt.s32.totalorder %s790_s4, %s565_s29 }
  0x28   : > { %p562_p6 = pnand %p560_p3, %p546_p5  ;;  %p568_p4 = scmp.lt.s32.totalorder %s566_s3, %s559_s20 }
  0x2a   : > { %p563_p11 = pneg %p562_p6  ;;  %p569_p10 = por %p568_p4, %p567_p9 }
  0x2c   : > { %p570_p12 = pnand %p569_p10, %p563_p11 }
  0x2e   : > { %573 = shalt.err (!%p570_p12)
}
  0x2f   : > { %476 = dma.hbm_to_vmem [thread:$0]  (!%p794_p0), %s786_s30, 128, %s790_s4, %s134_s6  }
  0x30   : > { %p956_p1 = scmp.lt.s32.totalorder %s690_s14, 3  ;;  %p957_p2 = scmp.ge.s32.totalorder %s690_s14, 1 }
  0x31   : > { %s839_s16 = scalar_lea.hbm %s947_s1, %s464_s27  ;;  %s158_s18 = scalar_lea.vmem [#allocation5], %s449_s26 }
  0x32   : > { %p830_p7 = pnand %p957_p2, %p956_p1  ;;  %s168_s19 = sshll.u32 %s158_s18, 4  ;;  %s169_s19 = int_to_ptr.vmem [resolvable:$true] %s168_s19 }
  0x33   : > { %s155_s30 = scalar_lea.sflag [#allocation6], %s777_s25  ;;  %s574_s4 = scalar_lea.hbm %s839_s16, 128 }
  0x34   : > { %s958_s7 = scalar_select %p830_p7, 1, 0 }
  0x35   : > { %p575_p9 = scmp.ne.s32.totalorder %s839_s16, %s574_s4  ;;  %s579_s27 = scalar_lea.hbm %s947_s1, 256 }
  0x36   : > { %p580_p3 = scmp.lt.u32.totalorder %s839_s16, %s947_s1  ;;  %p581_p6 = scmp.lt.u32.totalorder %s579_s27, %s574_s4 }
  0x37   : > { %p577_p11 = pnand %p575_p9, %p546_p5  ;;  %p583_p10 = scmp.lt.u32.totalorder %s574_s4, %s839_s16 }
  0x38   : > { %p582_p4 = por %p581_p6, %p580_p3 }
  0x39   : > { %p578_p13 = pneg %p577_p11 }
  0x3a   : > { %p584_p12 = por %p583_p10, %p582_p4 }
  0x3c   : > { %p585_p1 = pnand %p584_p12, %p578_p13 }
  0x3e   : > { %588 = shalt.err (!%p585_p1)
}
  0x3f   : > { %s589_s25 = scalar_lea.vmem %s169_s19, 128  ;;  %s693_s26 = smov [#allocation5]  }
  0x40   : > { %p590_p2 = scmp.ne.s32.totalorder %s169_s19, %s589_s25  ;;  %s594_s3 = sshll.u32 %s693_s26, 4  ;;  %s595_s3 = int_to_ptr.vmem [resolvable:$false] %s594_s3 }
  0x41   : > { %s596_s8 = scalar_lea.vmem %s595_s3, 256  ;;  %p597_p8 = scmp.lt.s32.totalorder %s169_s19, %s595_s3 }
  0x42   : > { %p592_p9 = pnand %p590_p2, %p546_p5  ;;  %p598_p7 = scmp.lt.s32.totalorder %s596_s8, %s589_s25 }
  0x44   : > { %p593_p11 = pneg %p592_p9  ;;  %p599_p3 = por %p598_p7, %p597_p8 }
  0x46   : > { %p600_p6 = pnand %p599_p3, %p593_p11 }
  0x48   : > { %603 = shalt.err (!%p600_p6)
}
  0x49   : > { %479 = dma.hbm_to_vmem [thread:$0]  (!%p794_p0), %s839_s16, 128, %s169_s19, %s155_s30  }
  0x4a   : > { %p959_p13 = scmp.ne.s32.totalorder %s958_s7, 0 }
  0x4b   : > { %s866_s15 = sand.u32 (!%p959_p13), 1, %s674_s10   ;;  %p960_p5 = scmp.ne.s32.totalorder (!%p959_p13), %s952_s21, 0 }
  0x4c   : > { %177 = sbr.rel (%p959_p13) target bundleno = 145 (0x91), region = 28  ;;  %s456_s18 = sshll.u32 (!%p959_p13), %s866_s15, 3 }
  0x4d   : > { %s180_s4 = scalar_lea.sflag (!%p959_p13), [#allocation3], %s866_s15  ;;  %s183_s6 = scalar_lea.vmem (!%p959_p13), [#allocation2], %s456_s18 }
  0x53   : > { %657 = dma.done.wait (%p960_p5), %s180_s4, 128  }
  0x54   : > { %659 = vsyncadd (%p960_p5), %s180_s4, 4294967168  ;;  %s189_s5 = scalar_lea.sflag [#allocation6], %s866_s15  ;;  %s192_s16 = scalar_lea.vmem [#allocation5], %s456_s18 }
  0x55   : > { %661 = dma.done.wait (%p960_p5), %s189_s5, 128  }
  0x56   : > { %663 = vsyncadd (%p960_p5), %s189_s5, 4294967168  ;;  %s458_s7 = sshll.u32 %s866_s15, 4  ;;  %v694_v0 = vmov 0.0   ;;  %v226_v1 = vld [vmem:[%s183_s6] sm:$0xff]  ;;  %v227_v2 = vld [vmem:[%s192_s16] sm:$0xff]  ;;  %vm232_vm0 = vcmask 1043456   ;;  %v304_v58 = vlaneseq }
  0x57   : > { %s880_s19 = scalar_lea.vmem [#allocation7], %s458_s7  ;;  %v228_v3 = vmul.f32 %v227_v2, %v226_v1  ;;  %v247_v4 = vmul.f32 %v226_v1, %v226_v1  ;;  %v265_v5 = vmul.f32 %v227_v2, %v227_v2  ;;  %v695_v56 = vmov 1966171168   ;;  %s466_s21 = sshll.u32 %s682_s12, 8 }
  0x58   : > { %224 = vst [vmem:[%s880_s19] sm:$0xff] %v694_v0  ;;  %225 = vst [vmem:[%s880_s19 + $0x8] sm:$0xff] %v694_v0  ;;  %v302_v57 = vunpack.c.l.s4 %v695_v56  ;;  %v305_v1 = vshrl.u32 %v304_v58, 7  ;;  %s338_s30 = sshll.u32 %s880_s19, 4  ;;  %vm319_vm1 = vcmp.lt.s32.totalorder %v304_v58, 256  ;;  %s896_s28 = scalar_lea.hbm %s948_s2, %s466_s21  ;;  %s898_s30 = int_to_ptr.vmem [resolvable:$true] %s338_s30 }
  0x59   : > { %v230_v6 = vcombine.high %v228_v3, %v228_v3  ;;  %v233_v7 = vsel %vm232_vm0, %v228_v3, 0.0  ;;  %v249_v8 = vcombine.high %v247_v4, %v247_v4  ;;  %v251_v9 = vsel %vm232_vm0, %v247_v4, 0.0  ;;  %s324_s29 = scalar_lea.sflag [#allocation4], %s866_s15  ;;  %s604_s25 = scalar_lea.vmem %s898_s30, 256 }
  0x5a   : > { %v252_v10 = vrot.slane %v251_v9, 4  ;;  %v267_v11 = vcombine.high %v265_v5, %v265_v5  ;;  %v269_v12 = vsel %vm232_vm0, %v265_v5, 0.0  ;;  %v234_v13 = vrot.slane %v233_v7, 4  ;;  %p605_p8 = scmp.ne.s32.totalorder %s898_s30, %s604_s25  ;;  %p961_p0 = scmp.ne.s32.totalorder %s953_s22, 0 }
  0x5b   : > { %v240_v14 = vsel %vm232_vm0, %v230_v6, 0.0  ;;  %v258_v15 = vsel %vm232_vm0, %v249_v8, 0.0  ;;  %v270_v16 = vrot.slane %v269_v12, 4  ;;  %v303_v0 = vunpack.c.0.s8 %v302_v57  ;;  %s696_s12 = smov [#allocation7]  }
  0x5c   : > { %v253_v17 = vadd.f32 %v252_v10, %v251_v9  ;;  %v259_v18 = vrot.slane %v258_v15, 4  ;;  %v241_v19 = vrot.slane %v240_v14, 4  ;;  %v276_v21 = vsel %vm232_vm0, %v267_v11, 0.0  ;;  %p606_p7 = pnand %p605_p8, %p961_p0  ;;  %s608_s26 = sshll.u32 %s696_s12, 4  ;;  %s609_s26 = int_to_ptr.vmem [resolvable:$false] %s608_s26 }
  0x5d   : > { %v271_v20 = vadd.f32 %v270_v16, %v269_v12  ;;  %v235_v24 = vadd.f32 %v234_v13, %v233_v7  ;;  %v277_v26 = vrot.slane %v276_v21, 4  ;;  %v306_v6 = vsub.s32 %v303_v0, %v305_v1  ;;  %s610_s3 = scalar_lea.vmem %s609_s26, 512  ;;  %p611_p10 = scmp.lt.s32.totalorder %s898_s30, %s609_s26 }
  0x5e   : > { %v254_v22 = vrot.slane %v253_v17, 2  ;;  %v260_v23 = vadd.f32 %v259_v18, %v258_v15  ;;  %v242_v29 = vadd.f32 %v241_v19, %v240_v14  ;;  %p607_p4 = pneg %p606_p7  ;;  %p612_p12 = scmp.lt.s32.totalorder %s610_s3, %s604_s25 }
  0x5f   : > { %v272_v25 = vrot.slane %v271_v20, 2  ;;  %v278_v31 = vadd.f32 %v277_v26, %v276_v21  ;;  %v236_v34 = vrot.slane %v235_v24, 2  ;;  %v297_v9 = vld [vmem:[%s880_s19] ss:$8 sm:$0x3] }
  0x60   : > { %v255_v27 = vadd.f32 %v254_v22, %v253_v17  ;;  %v261_v28 = vrot.slane %v260_v23, 2  ;;  %v243_v39 = vrot.slane %v242_v29, 2  ;;  %p613_p1 = por %p612_p12, %p611_p10 }
  0x61   : > { %v273_v30 = vadd.f32 %v272_v25, %v271_v20  ;;  %v279_v36 = vrot.slane %v278_v31, 2  ;;  %v237_v44 = vadd.f32 %v236_v34, %v235_v24 }
  0x62   : > { %v256_v32 = vrot.slane %v255_v27, 1  ;;  %v262_v33 = vadd.f32 %v261_v28, %v260_v23  ;;  %v244_v48 = vadd.f32 %v243_v39, %v242_v29  ;;  %p614_p2 = pnand %p613_p1, %p607_p4 }
  0x63   : > { %v274_v35 = vrot.slane %v273_v30, 1  ;;  %v280_v41 = vadd.f32 %v279_v36, %v278_v31  ;;  %v238_v50 = vrot.slane %v237_v44, 1 }
  0x64   : > { %v257_v37 = vadd.f32 %v256_v32, %v255_v27  ;;  %v263_v38 = vrot.slane %v262_v33, 1  ;;  %v245_v52 = vrot.slane %v244_v48, 1 }
  0x65   : > { %v275_v40 = vadd.f32 %v274_v35, %v273_v30  ;;  %v281_v45 = vrot.slane %v280_v41, 1  ;;  %v239_v53 = vadd.f32 %v238_v50, %v237_v44 }
  0x66   : > { %v264_v42 = vadd.f32 %v263_v38, %v262_v33  ;;  %v283_v43 = vmax.f32 %v257_v37, 1e-16  ;;  %v246_v54 = vadd.f32 %v245_v52, %v244_v48 }
  0x67   : > { %v289_v46 = vmax.f32 %v275_v40, 1e-16  ;;  %v282_v49 = vadd.f32 %v281_v45, %v280_v41 }
  0x68   : > { %v284_v47 = vmax.f32 %v264_v42, 1e-16  ;;  %536 = vrsqrt.f32 %v283_v43 }
  0x69   : > { %538 = vrsqrt.f32 %v289_v46  ;;  %v290_v51 = vmax.f32 %v282_v49, 1e-16 }
  0x6a   : > { %540 = vrsqrt.f32 %v284_v47 }
  0x6b   : > { %542 = vrsqrt.f32 %v290_v51 }
  0x72   : > { %v537_v55 = vpop.eup %536 }
  0x73   : > { %v539_v59 = vpop.eup %538  ;;  %v287_v60 = vmul.f32 %v537_v55, %v239_v53 }
  0x74   : > { %v541_v61 = vpop.eup %540 }
  0x75   : > { %v288_v62 = vmul.f32 %v541_v61, %v246_v54  ;;  %v293_v63 = vmul.f32 %v539_v59, %v287_v60  ;;  %v543_v2 = vpop.eup %542 }
  0x77   : > { %v294_v3 = vmul.f32 %v543_v2, %v288_v62  ;;  %v295_v4 = vsub.f32 1.0, %v293_v63 }
  0x79   : > { %v296_v5 = vsub.f32 1.0, %v294_v3 }
  0x7b   : > { %v300_v7 = vcombine.low %v295_v4, %v296_v5 }
  0x7d   : > { %v307_v8 = vrot.slane %v300_v7, %v306_v6 }
  0x7f   : > { %v314_v10 = vrot.slane %v307_v8, %v306_v6 }
  0x81   : > { %v316_v11 = vadd.f32 %v314_v10, %v297_v9 }
  0x83   : > { %321 = vst.msk [vmem:[%s880_s19] ss:$8 sm:$0x3] %vm319_vm1, %v316_v11 }
  0x84   : > { %617 = shalt.err (!%p614_p2)
}
  0x85   : > { %s618_s8 = scalar_lea.hbm %s896_s28, 256  ;;  %s622_s4 = scalar_lea.hbm %s948_s2, 512 }
  0x86   : > { %p619_p9 = scmp.ne.s32.totalorder %s896_s28, %s618_s8  ;;  %p623_p6 = scmp.lt.u32.totalorder %s896_s28, %s948_s2 }
  0x87   : > { %p624_p13 = scmp.lt.u32.totalorder %s622_s4, %s618_s8  ;;  %p626_p8 = scmp.lt.u32.totalorder %s618_s8, %s896_s28 }
  0x88   : > { %p620_p11 = pnand %p619_p9, %p961_p0 }
  0x89   : > { %p625_p5 = por %p624_p13, %p623_p6 }
  0x8a   : > { %p621_p3 = pneg %p620_p11 }
  0x8b   : > { %p627_p7 = por %p626_p8, %p625_p5 }
  0x8d   : > { %p628_p4 = pnand %p627_p7, %p621_p3 }
  0x8f   : > { %631 = shalt.err (!%p628_p4)
}
  0x90   : > { %471 = dma.vmem_to_hbm [thread:$0]  (%p961_p0), %s898_s30, 256, %s896_s28, %s324_s29  }
  0x91 PF: > { %s350_s16 = sand.u32 1, %s670_s9   ;;  %p962_p10 = scmp.ne.s32.totalorder %s954_s24, 0 }
  0x92   : > { %p963_p12 = scmp.ge.s32.totalorder %s690_s14, 2  ;;  %s351_s7 = scalar_lea.sflag [#allocation4], %s350_s16 }
  0x94   : > { %p481_p1 = pnand %p963_p12, %p962_p10 }
  0x96   : > { %665 = dma.done.wait (!%p481_p1), %s351_s7, 256  }
  0x97   : > { %667 = vsyncadd (!%p481_p1), %s351_s7, 4294967040  ;;  %s21_s14 = sadd.s32 1, %s690_s14   ;;  %s964_s9 = smov %s674_s10 }
  0x98   : > { %p18_p2 = scmp.ge.s32.totalorder %s21_s14, 4   ;;  %s965_s10 = smov %s678_s11 }
  0x99   : > { %s966_s11 = smov %s768_s23  ;;  %s967_s12 = smov %s686_s13 }
  0x9a   : > { %s968_s13 = smov %s970_s17  ;;  %20 = sbr.rel (!%p18_p2) target bundleno = 8 (0x8), region = 90 }
  0xa1   :  { %356 = vsyncpa [#allocation3], 1 }
  0xa2   :  { %358 = vsyncpa [#allocation3 + $0x1], 1 }
  0xa3   :  { %359 = vsyncpa [#allocation6], 1 }
  0xa4   :  { %361 = vsyncpa [#allocation6 + $0x1], 1 }
  0xa5   :  { %362 = vsyncpa [#allocation4], 1 }
  0xa6   :  { %364 = vsyncpa [#allocation4 + $0x1], 1 }

</bundles_post_ra>
